<compile_context>
chip_gen: v5e
topology: v5e:2x2
jax: 0.10.0
libtpu: 0.0.40
codegen_flags: <defaults>
</compile_context>

<pallas_src>
import jax
import jax.numpy as jnp
import numpy as np
from jax.experimental import pallas as pl
from jax.experimental.pallas import tpu as pltpu


def _attention_gate_kernel(
    x_ref, g_ref,          # (1, C_in, T)  pixel tiles (lane axis = pixels)
    wt_ref, bt_ref,        # theta conv:              (C_out, C_in), (C_out, 1)
    wgp_ref, bgp_ref,      # fused gating+phi conv:   (C_out, C_in), (C_out, 1)
    wc_ref, bc_ref,        # final conv:              (C_out, C_out), (C_out, 1)
    o_ref,                 # (1, C_out, T)
):
    x = x_ref[0].astype(jnp.float32)          # (C_in, T)
    g = g_ref[0].astype(jnp.float32)          # (C_in, T)

    # theta = Wt @ x + bt       (1x1 conv, channels contract, pixels on lanes)
    theta = jnp.dot(wt_ref[...], x, preferred_element_type=jnp.float32) + bt_ref[...]
    # phi = (Wp @ Wg) @ g + (Wp @ bg + bp)   -- gating+phi folded in the wrapper
    phi = jnp.dot(wgp_ref[...], g, preferred_element_type=jnp.float32) + bgp_ref[...]

    # f = relu(theta + phi); att = sigmoid(f); att_x = x * att
    f = jnp.maximum(theta + phi, 0.0)
    # exp and the approximate reciprocal both execute in the (otherwise idle) EUP slot.
    att = pl.reciprocal(1.0 + jnp.exp(-f), approx=True)
    att_x = x * att

    # out = Wc @ att_x + bc
    out = jnp.dot(wc_ref[...], att_x, preferred_element_type=jnp.float32) + bc_ref[...]
    o_ref[0] = out.astype(o_ref.dtype)


def attention_gate_pallas(x_nchw, g_nchw, params, *, tile_hw=2048, io_dtype=None):
    """AttentionGate forward.

    x_nchw: (N, C_in, H, W); g_nchw: (N, C_in, Hg, Wg).
    Returns (N, C_out, Hg, Wg) if spatial sizes differ (matching the PyTorch
    module's final interpolation), else (N, C_out, H, W).

    tile_hw: pixels per kernel tile (sweep 1024-4096; rounded to a multiple of 128).
    io_dtype: optionally cast x/g (and the kernel output) to e.g. jnp.bfloat16 to
              halve HBM traffic; default keeps the input dtype.
    """
    N, C_in, H, W = x_nchw.shape
    C_out = params["wt"].shape[0]
    assert C_in == C_out, "x * att requires in_channels == out_channels (as in the PyTorch module)"

    g_spatial = tuple(g_nchw.shape[2:])

    # Glue: PyTorch interpolates gating(g) to x's spatial size before phi_g.
    # A 1x1 conv commutes with bilinear resizing (both linear; one acts on
    # channels, the other on space), so resizing g first is equivalent and lets
    # us fuse gating+phi into one matmul below.
    if g_spatial != (H, W):
        g_nchw = jax.image.resize(g_nchw, (N, C_in, H, W), method="bilinear")

    # Fold gating -> phi_g into a single linear map (tiny, done once outside the kernel).
    wt = params["wt"]
    bt = params["bt"].reshape(C_out, 1)
    wgp = params["wp"] @ params["wg"]                                  # (C_out, C_in)
    bgp = (params["wp"] @ params["bg"] + params["bp"]).reshape(C_out, 1)
    wc = params["wc"]
    bc = params["bc"].reshape(C_out, 1)

    io_dtype = x_nchw.dtype if io_dtype is None else jnp.dtype(io_dtype)

    # Free reshapes (contiguous dims collapse) -- no transposes, no extra HBM pass.
    HW = H * W
    x3 = x_nchw.reshape(N, C_in, HW)
    g3 = g_nchw.reshape(N, C_in, HW)
    if x3.dtype != io_dtype:
        x3 = x3.astype(io_dtype)
        g3 = g3.astype(io_dtype)

    # Tile the pixel axis: full HW if it fits, else a multiple of 128 (lane width).
    if HW <= tile_hw:
        tile = HW
    else:
        tile = max(128, (tile_hw // 128) * 128)
    n_tiles = pl.cdiv(HW, tile)
    grid = (N, n_tiles)

    def tile_spec(c):
        return pl.BlockSpec((1, c, tile), lambda n, t: (n, 0, t))

    def full_spec(arr):
        return pl.BlockSpec(arr.shape, lambda n, t: (0, 0))

    # VMEM budget: double-buffered x/g/out blocks + (tiny) weights, with headroom;
    # capped below v7x's 64 MiB physical VMEM.
    itemsize = np.dtype(io_dtype).itemsize
    block_io_bytes = (2 * C_in + C_out) * tile * itemsize
    vmem_limit = int(min(48 << 20, max(32 << 20, 4 * block_io_bytes + (4 << 20))))

    # NOTE: if a profile shows exposed DMA on v6e, add pipeline_mode=pl.Buffered(3)
    # to the x/g tile_specs.
    out3 = pl.pallas_call(
        _attention_gate_kernel,
        out_shape=jax.ShapeDtypeStruct((N, C_out, HW), io_dtype),
        grid_spec=pltpu.PrefetchScalarGridSpec(
            num_scalar_prefetch=0,
            grid=grid,
            in_specs=[
                tile_spec(C_in),            # x
                tile_spec(C_in),            # g
                full_spec(wt), full_spec(bt),
                full_spec(wgp), full_spec(bgp),
                full_spec(wc), full_spec(bc),
            ],
            out_specs=tile_spec(C_out),
        ),
        compiler_params=pltpu.CompilerParams(
            dimension_semantics=("parallel", "parallel"),
            vmem_limit_bytes=vmem_limit,
        ),
    )(x3, g3, wt, bt, wgp, bgp, wc, bc)

    out = out3.reshape(N, C_out, H, W)
    if out.dtype != x_nchw.dtype:
        out = out.astype(x_nchw.dtype)
    # PyTorch re-interpolates att_x back to g's spatial size if it differs.
    if (H, W) != g_spatial:
        out = jax.image.resize(out, (N, C_out) + g_spatial, method="bilinear")
    return out


def make_params(key, c_in, c_out, dtype=jnp.float32):
    """Same layout as PyTorch: Conv2d(k=1) weight (C_out, C_in), bias (C_out,)."""
    ks = jax.random.split(key, 8)

    def conv_init(kw, kb, cin, cout):
        bound = 1.0 / np.sqrt(cin)
        w = jax.random.uniform(kw, (cout, cin), dtype, -bound, bound)
        b = jax.random.uniform(kb, (cout,), dtype, -bound, bound)
        return w, b

    wt, bt = conv_init(ks[0], ks[1], c_in, c_out)    # theta_x
    wg, bg = conv_init(ks[2], ks[3], c_in, c_out)    # gating
    wp, bp = conv_init(ks[4], ks[5], c_out, c_out)   # phi_g
    wc, bc = conv_init(ks[6], ks[7], c_out, c_out)   # final conv
    return dict(wt=wt, bt=bt, wg=wg, bg=bg, wp=wp, bp=bp, wc=wc, bc=bc)


def attention_gate_reference(x, g, p):
    """Pure-JAX reference mirroring the PyTorch module (unfused, exact sigmoid)."""

    def conv1x1(t, w, b):
        return jnp.einsum("oc,nchw->nohw", w, t) + b.reshape(1, -1, 1, 1)

    theta = conv1x1(x, p["wt"], p["bt"])
    gc = conv1x1(g, p["wg"], p["bg"])
    if gc.shape[2:] != theta.shape[2:]:
        gc = jax.image.resize(gc, gc.shape[:2] + theta.shape[2:], method="bilinear")
    phi = conv1x1(gc, p["wp"], p["bp"])
    att = jax.nn.sigmoid(jnp.maximum(theta + phi, 0.0))
    out = conv1x1(x * att, p["wc"], p["bc"])
    if out.shape[2:] != g.shape[2:]:
        out = jax.image.resize(out, out.shape[:2] + g.shape[2:], method="bilinear")
    return out


if __name__ == "__main__":
    # x * att requires in_channels == out_channels in the original module.
    N, C, H, W = 2, 8, 16, 16
    key = jax.random.PRNGKey(0)
    kx, kg, kp = jax.random.split(key, 3)
    x = jax.random.normal(kx, (N, C, H, W), jnp.float32)
    g = jax.random.normal(kg, (N, C, H, W), jnp.float32)
    params = make_params(kp, C, C)

    out = attention_gate_pallas(x, g, params, tile_hw=2048)
    out = jax.block_until_ready(out)

    ref = attention_gate_reference(x, g, params)
    assert out.shape == (N, C, H, W)
    # Loose tolerance covers the EUP approximate reciprocal inside the sigmoid.
    np.testing.assert_allclose(np.asarray(out), np.asarray(ref), rtol=2e-2, atol=2e-2)

    print("KERNEL_OK")
</pallas_src>

<mosaic_0001>
module attributes {stable_mosaic.version = 11 : i64} {
  func.func @_attention_gate_kernel(%arg0: i32, %arg1: i32, %arg2: memref<1x8x256xf32, #tpu.memory_space<vmem>>, %arg3: memref<1x8x256xf32, #tpu.memory_space<vmem>>, %arg4: memref<8x8xf32, #tpu.memory_space<vmem>>, %arg5: memref<8x1xf32, #tpu.memory_space<vmem>>, %arg6: memref<8x8xf32, #tpu.memory_space<vmem>>, %arg7: memref<8x1xf32, #tpu.memory_space<vmem>>, %arg8: memref<8x8xf32, #tpu.memory_space<vmem>>, %arg9: memref<8x1xf32, #tpu.memory_space<vmem>>, %arg10: memref<1x8x256xf32, #tpu.memory_space<vmem>>) attributes {dimension_semantics = [#tpu.dimension_semantics<parallel>, #tpu.dimension_semantics<parallel>], iteration_bounds = array<i64: 2, 1>, scalar_prefetch = 0 : i64, scratch_operands = 0 : i64, tpu.core_type = #tpu.core_type<tc>, window_params = [{transform_indices = @transform_0, window_bounds = array<i64: 1, 8, 256>}, {transform_indices = @transform_1, window_bounds = array<i64: 1, 8, 256>}, {pipeline_mode = #tpu.pipeline_mode<synchronous>, transform_indices = @transform_2, window_bounds = array<i64: 8, 8>}, {pipeline_mode = #tpu.pipeline_mode<synchronous>, transform_indices = @transform_3, window_bounds = array<i64: 8, 1>}, {pipeline_mode = #tpu.pipeline_mode<synchronous>, transform_indices = @transform_4, window_bounds = array<i64: 8, 8>}, {pipeline_mode = #tpu.pipeline_mode<synchronous>, transform_indices = @transform_5, window_bounds = array<i64: 8, 1>}, {pipeline_mode = #tpu.pipeline_mode<synchronous>, transform_indices = @transform_6, window_bounds = array<i64: 8, 8>}, {pipeline_mode = #tpu.pipeline_mode<synchronous>, transform_indices = @transform_7, window_bounds = array<i64: 8, 1>}, {transform_indices = @transform_8, window_bounds = array<i64: 1, 8, 256>}]} {
    %c0 = arith.constant 0 : index
    %c0_0 = arith.constant 0 : index
    %c0_1 = arith.constant 0 : index
    %0 = vector.load %arg2[%c0, %c0_0, %c0_1] : memref<1x8x256xf32, #tpu.memory_space<vmem>>, vector<1x8x256xf32>
    %1 = vector.shape_cast %0 : vector<1x8x256xf32> to vector<8x256xf32>
    %c0_2 = arith.constant 0 : index
    %c0_3 = arith.constant 0 : index
    %c0_4 = arith.constant 0 : index
    %2 = vector.load %arg3[%c0_2, %c0_3, %c0_4] : memref<1x8x256xf32, #tpu.memory_space<vmem>>, vector<1x8x256xf32>
    %3 = vector.shape_cast %2 : vector<1x8x256xf32> to vector<8x256xf32>
    %c0_5 = arith.constant 0 : index
    %c0_6 = arith.constant 0 : index
    %4 = vector.load %arg4[%c0_5, %c0_6] : memref<8x8xf32, #tpu.memory_space<vmem>>, vector<8x8xf32>
    %cst = arith.constant dense<0.000000e+00> : vector<8x256xf32>
    %5 = tpu.matmul %4, %1, %cst {dimension_numbers = #tpu.dot_dimension_numbers<[1], [0], [0], [1], [0, 0, 1, 1], [], []>} : vector<8x8xf32>, vector<8x256xf32>, vector<8x256xf32> -> vector<8x256xf32>
    %c0_7 = arith.constant 0 : index
    %c0_8 = arith.constant 0 : index
    %6 = vector.load %arg5[%c0_7, %c0_8] : memref<8x1xf32, #tpu.memory_space<vmem>>, vector<8x1xf32>
    %7 = vector.broadcast %6 : vector<8x1xf32> to vector<8x256xf32>
    %8 = arith.addf %5, %7 : vector<8x256xf32>
    %c0_9 = arith.constant 0 : index
    %c0_10 = arith.constant 0 : index
    %9 = vector.load %arg6[%c0_9, %c0_10] : memref<8x8xf32, #tpu.memory_space<vmem>>, vector<8x8xf32>
    %cst_11 = arith.constant dense<0.000000e+00> : vector<8x256xf32>
    %10 = tpu.matmul %9, %3, %cst_11 {dimension_numbers = #tpu.dot_dimension_numbers<[1], [0], [0], [1], [0, 0, 1, 1], [], []>} : vector<8x8xf32>, vector<8x256xf32>, vector<8x256xf32> -> vector<8x256xf32>
    %c0_12 = arith.constant 0 : index
    %c0_13 = arith.constant 0 : index
    %11 = vector.load %arg7[%c0_12, %c0_13] : memref<8x1xf32, #tpu.memory_space<vmem>>, vector<8x1xf32>
    %12 = vector.broadcast %11 : vector<8x1xf32> to vector<8x256xf32>
    %13 = arith.addf %10, %12 : vector<8x256xf32>
    %14 = arith.addf %8, %13 : vector<8x256xf32>
    %cst_14 = arith.constant 0.000000e+00 : f32
    %15 = vector.broadcast %cst_14 : f32 to vector<8x256xf32>
    %16 = arith.maximumf %14, %15 : vector<8x256xf32>
    %cst_15 = arith.constant 0.000000e+00 : f32
    %17 = vector.broadcast %cst_15 : f32 to vector<8x256xf32>
    %18 = arith.subf %17, %16 : vector<8x256xf32>
    %19 = math.exp %18 : vector<8x256xf32>
    %cst_16 = arith.constant 1.000000e+00 : f32
    %20 = vector.broadcast %cst_16 : f32 to vector<8x256xf32>
    %21 = arith.addf %20, %19 : vector<8x256xf32>
    %22 = tpu.reciprocal %21 {approx = true} : vector<8x256xf32> -> vector<8x256xf32>
    %23 = arith.mulf %1, %22 : vector<8x256xf32>
    %c0_17 = arith.constant 0 : index
    %c0_18 = arith.constant 0 : index
    %24 = vector.load %arg8[%c0_17, %c0_18] : memref<8x8xf32, #tpu.memory_space<vmem>>, vector<8x8xf32>
    %cst_19 = arith.constant dense<0.000000e+00> : vector<8x256xf32>
    %25 = tpu.matmul %24, %23, %cst_19 {dimension_numbers = #tpu.dot_dimension_numbers<[1], [0], [0], [1], [0, 0, 1, 1], [], []>} : vector<8x8xf32>, vector<8x256xf32>, vector<8x256xf32> -> vector<8x256xf32>
    %c0_20 = arith.constant 0 : index
    %c0_21 = arith.constant 0 : index
    %26 = vector.load %arg9[%c0_20, %c0_21] : memref<8x1xf32, #tpu.memory_space<vmem>>, vector<8x1xf32>
    %27 = vector.broadcast %26 : vector<8x1xf32> to vector<8x256xf32>
    %28 = arith.addf %25, %27 : vector<8x256xf32>
    %c0_22 = arith.constant 0 : index
    %c0_23 = arith.constant 0 : index
    %c0_24 = arith.constant 0 : index
    %29 = vector.load %arg10[%c0_22, %c0_23, %c0_24] : memref<1x8x256xf32, #tpu.memory_space<vmem>>, vector<1x8x256xf32>
    %30 = vector.shape_cast %29 : vector<1x8x256xf32> to vector<8x256xf32>
    %31 = vector.shape_cast %28 : vector<8x256xf32> to vector<1x8x256xf32>
    tpu.vector_store %arg10[%c0_22, %c0_23, %c0_24], %31 {strides = array<i32>} : memref<1x8x256xf32, #tpu.memory_space<vmem>>, vector<1x8x256xf32>,
    return
  }
  func.func @transform_0(%arg0: i32, %arg1: i32) -> (i32, i32, i32) {
    %c0_i32 = arith.constant 0 : i32
    %c0_i32_0 = arith.constant 0 : i32
    return %arg0, %c0_i32, %arg1 : i32, i32, i32
  }
  func.func @transform_1(%arg0: i32, %arg1: i32) -> (i32, i32, i32) {
    %c0_i32 = arith.constant 0 : i32
    %c0_i32_0 = arith.constant 0 : i32
    return %arg0, %c0_i32, %arg1 : i32, i32, i32
  }
  func.func @transform_2(%arg0: i32, %arg1: i32) -> (i32, i32) {
    %c0_i32 = arith.constant 0 : i32
    %c0_i32_0 = arith.constant 0 : i32
    %c0_i32_1 = arith.constant 0 : i32
    return %c0_i32, %c0_i32_0 : i32, i32
  }
  func.func @transform_3(%arg0: i32, %arg1: i32) -> (i32, i32) {
    %c0_i32 = arith.constant 0 : i32
    %c0_i32_0 = arith.constant 0 : i32
    %c0_i32_1 = arith.constant 0 : i32
    return %c0_i32, %c0_i32_0 : i32, i32
  }
  func.func @transform_4(%arg0: i32, %arg1: i32) -> (i32, i32) {
    %c0_i32 = arith.constant 0 : i32
    %c0_i32_0 = arith.constant 0 : i32
    %c0_i32_1 = arith.constant 0 : i32
    return %c0_i32, %c0_i32_0 : i32, i32
  }
  func.func @transform_5(%arg0: i32, %arg1: i32) -> (i32, i32) {
    %c0_i32 = arith.constant 0 : i32
    %c0_i32_0 = arith.constant 0 : i32
    %c0_i32_1 = arith.constant 0 : i32
    return %c0_i32, %c0_i32_0 : i32, i32
  }
  func.func @transform_6(%arg0: i32, %arg1: i32) -> (i32, i32) {
    %c0_i32 = arith.constant 0 : i32
    %c0_i32_0 = arith.constant 0 : i32
    %c0_i32_1 = arith.constant 0 : i32
    return %c0_i32, %c0_i32_0 : i32, i32
  }
  func.func @transform_7(%arg0: i32, %arg1: i32) -> (i32, i32) {
    %c0_i32 = arith.constant 0 : i32
    %c0_i32_0 = arith.constant 0 : i32
    %c0_i32_1 = arith.constant 0 : i32
    return %c0_i32, %c0_i32_0 : i32, i32
  }
  func.func @transform_8(%arg0: i32, %arg1: i32) -> (i32, i32, i32) {
    %c0_i32 = arith.constant 0 : i32
    %c0_i32_0 = arith.constant 0 : i32
    return %arg0, %c0_i32, %arg1 : i32, i32, i32
  }
}

</mosaic_0001>

<bundles_post_ra>
// kernel: tpu_custom_call.1
= control target key start
LH: loop header
LB: loop body
LE: loop exit
PB: predicated region body
PF: predicated region fallthrough
CT: control target
= control target key end

     0   :  { %13 = vsyncpa [#allocation3], 0  ;;  %s1148_s0 = inlined_call_operand.hbm [shape: f32[2,8,256], index: 0, kind: input, shape index: {}]   ;;  %s1149_s1 = inlined_call_operand.hbm [shape: f32[2,8,256], index: 1, kind: input, shape index: {}]   ;;  %s1150_s2 = inlined_call_operand.vmem [shape: f32[8,8], index: 2, kind: input, shape index: {}]   ;;  %s1151_s3 = inlined_call_operand.vmem [shape: f32[8,1], index: 3, kind: input, shape index: {}]   ;;  %s1152_s4 = inlined_call_operand.vmem [shape: f32[8,8], index: 4, kind: input, shape index: {}]   ;;  %s1153_s5 = inlined_call_operand.vmem [shape: f32[8,1], index: 5, kind: input, shape index: {}]   ;;  %s1154_s6 = inlined_call_operand.vmem [shape: f32[8,8], index: 6, kind: input, shape index: {}]   ;;  %s1155_s7 = inlined_call_operand.vmem [shape: f32[8,1], index: 7, kind: input, shape index: {}]   ;;  %s1156_s8 = inlined_call_operand.hbm [shape: f32[2,8,256], index: 8, kind: output, shape index: {}]  }
   0x1   :  { %15 = vsyncpa [#allocation3 + $0x1], 0 }
   0x2   :  { %16 = vsyncpa [#allocation6], 0 }
   0x3   :  { %18 = vsyncpa [#allocation6 + $0x1], 0 }
   0x4   :  { %19 = vsyncpa [#allocation4], 0 }
   0x5   :  { %21 = vsyncpa [#allocation4 + $0x1], 0  ;;  %s991_s27 = smov 0   ;;  %s993_s28 = smov 0  }
   0x6   :  { %s995_s29 = smov 0   ;;  %s997_s30 = smov 0  }
   0x7   :  { %s999_s9 = smov 0   ;;  %s1001_s10 = smov 0  }
   0x8 LB: > { %1161 = sst [smem:[#allocation11_spill]] %s931_s29  ;;  %s691_s11 = sadd.s32 4294967295, %s943_s10   ;;  %s943_s10 = sphi %s1001_s10, %s27_s10   ;;  %s939_s9 = sphi %s999_s9, %s1174_s9   ;;  %s935_s30 = sphi %s997_s30, %s1173_s30   ;;  %s931_s29 = sphi %s995_s29, %s1172_s29   ;;  %s927_s28 = sphi %s993_s28, %s1176_s28   ;;  %s923_s27 = sphi %s991_s27, %s1175_s27  }
   0x9   : > { %1162 = sst [smem:[#allocation12_spill]] %s939_s9  ;;  %s692_s12 = sadd.s32 4294967294, %s943_s10  }
   0xa   : > { %s39_s13 = sadd.s32 1, %s939_s9  ;;  %s48_s14 = sadd.s32 1, %s931_s29 }
   0xb   : > { %p41_p0 = scmp.ge.s32.totalorder %s39_s13, 2  ;;  %p55_p1 = scmp.ne.s32.totalorder %s931_s29, %s927_s28 }
   0xc   : > { %p56_p2 = scmp.eq.s32.totalorder %s943_s10, 0  ;;  %p61_p3 = scmp.ne.s32.totalorder %s927_s28, %s923_s27 }
   0xd   : > { %s1178_s13 = smov (%p41_p0, %s39_s13), 0  ;;  %p62_p5 = scmp.eq.s32.totalorder %s691_s11, 0 }
   0xe   : > { %1163 = sst [smem:[#allocation13_spill]] %s1178_s13  ;;  %p1032_p4 = por %p56_p2, %p55_p1 }
   0xf   : > { %s43_s16 = ssub.s32 %s939_s9, %s1178_s13  ;;  %p241_p6 = scmp.eq.s32.totalorder %s691_s11, 1 }
  0x10   : > { %p46_p7 = scmp.eq.s32.totalorder %s43_s16, 0  ;;  %p1038_p8 = por %p62_p5, %p61_p3 }
  0x11   : > { %p1042_p9 = por %p241_p6, %p55_p1  ;;  %p247_p10 = scmp.eq.s32.totalorder %s692_s12, 1 }
  0x12   : > { %s1047_s19 = scalar_select %p46_p7, %s931_s29, %s48_s14  }
  0x13   : > { %p1049_p11 = por %p247_p10, %p61_p3  ;;  %p694_p12 = scmp.ge.s32.totalorder %s943_s10, 2 }
  0x14   : > { %1167 = sst [smem:[#allocation14_spill]] %s1047_s19  ;;  %p736_p13 = scmp.lt.s32.totalorder %s943_s10, 2 }
  0x15   : > { %s1168_s20 = scalar_select %p1049_p11, 1, 0 }
  0x16   : > { %s285_s21 = sand.u32 1, %s931_s29   ;;  %s716_s23 = sshll.u32 %s939_s9, 4 }
  0x17   : > { %1169 = sst [smem:[#allocation15_spill]] %s1168_s20  ;;  %s695_s22 = sshll.u32 %s285_s21, 4 }
  0x18   : > { %s296_s26 = scalar_lea.hbm %s1148_s0, %s716_s23  ;;  %s289_s11 = scalar_lea.vmem [#allocation2], %s695_s22 }
  0x19   : > { %s300_s16 = sshll.u32 %s289_s11, 4  ;;  %s298_s13 = sshll.u32 %s296_s26, 4  ;;  %s301_s16 = int_to_ptr.vmem [resolvable:$true] %s300_s16  ;;  %s299_s13 = int_to_ptr.hbm [resolvable:$true] %s298_s13 }
  0x1a   : > { %p726_p0 = pnand %p736_p13, %p1032_p4  ;;  %p701_p1 = scmp.ge.s32.totalorder %s943_s10, 1 }
  0x1b   : > { %p327_p2 = scmp.lt.s32.totalorder %s943_s10, 3  ;;  %s286_s12 = scalar_lea.sflag [#allocation3], %s285_s21 }
  0x1c   : > { %728 = dma.hbm_to_vmem [thread:$0]  (!%p726_p0), %s299_s13, 256, %s301_s16, %s286_s12  }
  0x1d   : > { %p328_p3 = pnand %p701_p1, %p327_p2  ;;  %s318_s9 = scalar_lea.hbm %s1149_s1, %s716_s23 }
  0x1e   : > { %s311_s29 = scalar_lea.vmem [#allocation5], %s695_s22  ;;  %s320_s24 = sshll.u32 %s318_s9, 4  ;;  %s321_s24 = int_to_ptr.hbm [resolvable:$true] %s320_s24 }
  0x1f   : > { %s322_s20 = sshll.u32 %s311_s29, 4  ;;  %s308_s25 = scalar_lea.sflag [#allocation6], %s285_s21  ;;  %s323_s20 = int_to_ptr.vmem [resolvable:$true] %s322_s20 }
  0x20   : > { %731 = dma.hbm_to_vmem [thread:$0]  (!%p726_p0), %s321_s24, 256, %s323_s20, %s308_s25  }
  0x21   : > { %331 = sbr.rel (%p328_p3) target bundleno = 339 (0x153), region = 52  ;;  %s1068_s15 = sand.u32 (!%p328_p3), 1, %s927_s28  }
  0x22   : > { %s1071_s13 = sshll.u32 (!%p328_p3), %s1068_s15, 4  ;;  %s334_s26 = scalar_lea.sflag (!%p328_p3), [#allocation3], %s1068_s15 }
  0x23   : > { %s337_s19 = scalar_lea.vmem (!%p328_p3), [#allocation2], %s1071_s13 }
  0x26   : > { %910 = dma.done.wait (%p1038_p8), %s334_s26, 256  }
  0x27   : > { %912 = vsyncadd (%p1038_p8), %s334_s26, 4294967040  ;;  %s344_s29 = scalar_lea.sflag [#allocation6], %s1068_s15  ;;  %s347_s9 = scalar_lea.vmem [#allocation5], %s1071_s13 }
  0x28   : > { %914 = dma.done.wait (%p1038_p8), %s344_s29, 256  }
  0x29   : > { %916 = vsyncadd (%p1038_p8), %s344_s29, 4294967040  ;;  %v945_v0 = vmov 0   ;;  %v389_v1 = vld [vmem:[%s337_s19] sm:$0xff]  ;;  %v390_v2 = vld [vmem:[%s337_s19 + $0x8] sm:$0xff]  ;;  %vm400_vm0 = vcmask 64512   ;;  %s718_s19 = sshll.u32 %s935_s30, 4 }
  0x2a   : > { %787 = vset.pattern.permute.xlu0 %v945_v0  ;;  %788 = vset.pattern.permute.xlu1 %v945_v0  ;;  %v391_v3 = vld [vmem:[%s347_s9] sm:$0xff]  ;;  %v392_v4 = vld [vmem:[%s347_s9 + $0x8] sm:$0xff]  ;;  %s576_s20 = scalar_lea.hbm %s1156_s8, %s718_s19  ;;  %s385_s21 = scalar_lea.vmem [#allocation7], %s1071_s13 }
  0x2b   : > { %419 = vmatpush.msra.mxu0 %v389_v1  ;;  %439 = vmatpush.msra.mxu1 %v390_v2  ;;  %v393_v5 = vld [vmem:[%s1150_s2] sm:$0xff]  ;;  %s578_s22 = sshll.u32 %s385_s21, 4  ;;  %s580_s23 = sshll.u32 %s576_s20, 4  ;;  %s579_s22 = int_to_ptr.vmem [resolvable:$true] %s578_s22  ;;  %s581_s23 = int_to_ptr.hbm [resolvable:$true] %s580_s23 }
  0x2c   : > { %v444_v6 = vld [vmem:[%s1152_s4] sm:$0xff]  ;;  %469 = vmatpush.msra.mxu2 %v391_v3  ;;  %489 = vmatpush.msra.mxu3 %v392_v4  ;;  %s563_s17 = scalar_lea.sflag [#allocation4], %s1068_s15  ;;  %s871_s11 = sshra.s32 %s581_s23, 4  ;;  %s872_s11 = int_to_ptr.hbm [resolvable:$true] %s871_s11 }
  0x2d   : > { %v394_v7 = vld [vmem:[%s1151_s3] sm:$0xff]  ;;  %705 = vmatmul.msk.f32.vlgmr.msra.gmra.mxu0 %vm400_vm0, %v393_v5  ;;  %706 = vmatmul.msk.f32.vlgmr.msra.gmra.mxu1 %vm400_vm0, %v393_v5  ;;  %s873_s30 = scalar_lea.hbm %s872_s11, 16  ;;  %s877_s12 = scalar_lea.hbm %s1156_s8, 32 }
  0x2e   : > { %707 = vmatmul.msk.f32.vlgmr.msra.gmra.mxu2 %vm400_vm0, %v444_v6  ;;  %708 = vmatmul.msk.f32.vlgmr.msra.gmra.mxu3 %vm400_vm0, %v444_v6  ;;  %v445_v8 = vld [vmem:[%s1153_s5] sm:$0xff]  ;;  %p874_p4 = scmp.ne.s32.totalorder %s872_s11, %s873_s30  ;;  %p878_p7 = scmp.lt.s32.totalorder %s872_s11, %s1156_s8 }
  0x2f   : > { %397 = vperm.xlu0 %787, %v394_v7   ;;  %v511_v13 = vld [vmem:[%s1155_s7] sm:$0xff]  ;;  %p879_p8 = scmp.lt.s32.totalorder %s877_s12, %s873_s30 }
  0x30   : > { %514 = vperm.xlu1 %788, %v511_v13   ;;  %v510_v35 = vld [vmem:[%s1154_s6] sm:$0xff]  ;;  %p875_p5 = pnand %p874_p4, %p1042_p9 }
  0x31   : > { %p880_p10 = por %p879_p8, %p878_p7 }
  0x32   : > { %p876_p6 = pneg %p875_p5 }
  0x34   : > { %p881_p13 = pnand %p880_p10, %p876_p6 }
  0x37   : > { %448 = vperm.xlu0 %787, %v445_v8  }
  0xa1   : > { %v398_v9 = vpop.permute.xlu0 %397 }
  0xa2   : > { %v515_v37 = vpop.permute.xlu1 %514 }
  0xa9   : > { %v449_v12 = vpop.permute.xlu0 %448 }
  0xaa   : > { %v421_v10 = vpop.f32.mrf.mxu0  ;;  %v441_v11 = vpop.f32.mrf.mxu1 }
  0xab   : > { %v422_v16 = vadd.f32 %v421_v10, %v398_v9  ;;  %v442_v17 = vadd.f32 %v441_v11, %v398_v9 }
  0xb1   : > { %v471_v14 = vpop.f32.mrf.mxu2  ;;  %v491_v15 = vpop.f32.mrf.mxu3 }
  0xb2   : > { %v472_v18 = vadd.f32 %v471_v14, %v449_v12  ;;  %v492_v19 = vadd.f32 %v491_v15, %v449_v12 }
  0xb4   : > { %v494_v20 = vadd.f32 %v472_v18, %v422_v16  ;;  %v495_v21 = vadd.f32 %v492_v19, %v442_v17 }
  0xb6   : > { %v496_v22 = vmax.f32 %v494_v20, 0.0  ;;  %v497_v23 = vmax.f32 %v495_v21, 0.0 }
  0xb8   : > { %v498_v24 = vsub.f32 0.0, %v496_v22  ;;  %v499_v25 = vsub.f32 0.0, %v497_v23 }
  0xba   : > { %v500_v26 = vmul.f32 1.442695, %v498_v24  ;;  %v502_v27 = vmul.f32 1.442695, %v499_v25 }
  0xbc   : > { %789 = vpow2.f32 %v500_v26 }
  0xbd   : > { %791 = vpow2.f32 %v502_v27 }
  0xc2   : > { %v790_v28 = vpop.eup %789 }
  0xc3   : > { %v792_v29 = vpop.eup %791  ;;  %v504_v30 = vadd.f32 1.0, %v790_v28 }
  0xc4   : > { %v505_v31 = vadd.f32 1.0, %v792_v29 }
  0xc5   : > { %793 = vrcp.f32 %v504_v30 }
  0xc6   : > { %795 = vrcp.f32 %v505_v31 }
  0xcb   : > { %v794_v32 = vpop.eup %793 }
  0xcc   : > { %v796_v33 = vpop.eup %795  ;;  %v508_v34 = vmul.f32 %v794_v32, %v389_v1 }
  0xcd   : > { %v509_v36 = vmul.f32 %v796_v33, %v390_v2 }
  0xce   : > { %535 = vmatpush.msrb.mxu0 %v508_v34 }
  0xcf   : > { %555 = vmatpush.msrb.mxu1 %v509_v36  ;;  %709 = vmatmul.msk.f32.vlgmr.msrb.gmra.mxu0 %vm400_vm0, %v510_v35 }
  0xd0   : > { %710 = vmatmul.msk.f32.vlgmr.msrb.gmra.mxu1 %vm400_vm0, %v510_v35 }
 0x14c   : > { %v537_v38 = vpop.f32.mrf.mxu0 }
 0x14d   : > { %v538_v39 = vadd.f32 %v537_v38, %v515_v37  ;;  %v557_v40 = vpop.f32.mrf.mxu1 }
 0x14e   : > { %v558_v41 = vadd.f32 %v557_v40, %v515_v37 }
 0x14f   : > { %560 = vst [vmem:[%s385_s21] sm:$0xff] %v538_v39 }
 0x150   : > { %561 = vst [vmem:[%s385_s21 + $0x8] sm:$0xff] %v558_v41 }
 0x151   : > { %884 = shalt.err (!%p881_p13)
}
 0x152   : > { %723 = dma.vmem_to_hbm [thread:$0]  (%p1042_p9), %s579_s22, 256, %s581_s23, %s563_s17  }
 0x153 PF: > { %s592_s25 = sand.u32 1, %s923_s27   ;;  %p733_p0 = pnand %p694_p12, %p1049_p11 }
 0x154   : > { %s593_s26 = scalar_lea.sflag [#allocation4], %s592_s25 }
 0x155   : > { %p734_p1 = pneg %p733_p0 }
 0x157   : > { %918 = dma.done.wait (%p734_p1), %s593_s26, 256  }
 0x158   : > { %920 = vsyncadd (%p734_p1), %s593_s26, 4294967040  ;;  %s27_s10 = sadd.s32 1, %s943_s10   ;;  %s1171_s19 = sld [smem:[#allocation11_spill]] }
 0x159   : > { %p24_p2 = scmp.ge.s32.totalorder %s27_s10, 4   ;;  %s1172_s29 = sld [smem:[#allocation14_spill]] }
 0x15a   : > { %s1173_s30 = sld [smem:[#allocation12_spill]]  ;;  %s1175_s27 = smov %s927_s28 }
 0x15b   : > { %s1174_s9 = sld [smem:[#allocation13_spill]]  ;;  %26 = sbr.rel (!%p24_p2) target bundleno = 8 (0x8), region = 110 }
 0x15e   : > { %s1176_s28 = smov %s1171_s19 }
 0x160   :  { %599 = vsyncpa [#allocation3], 1 }
 0x161   :  { %601 = vsyncpa [#allocation3 + $0x1], 1 }
 0x162   :  { %602 = vsyncpa [#allocation6], 1 }
 0x163   :  { %604 = vsyncpa [#allocation6 + $0x1], 1 }
 0x164   :  { %605 = vsyncpa [#allocation4], 1 }
 0x165   :  { %607 = vsyncpa [#allocation4 + $0x1], 1 }

</bundles_post_ra>
